<compile_context>
chip_gen: v6e
topology: v6e:2x2x1
jax: 0.10.0
libtpu: 0.0.40
codegen_flags: <defaults>
</compile_context>

<pallas_src>
import jax
import jax.numpy as jnp
from jax import lax
from jax.experimental import pallas as pl
from jax.experimental.pallas import tpu as pltpu

_LANE = 128   # lane-aligned padded width for hidden layers
_SUBL = 8     # sublane-aligned padded width for the (transposed) output layer


def _round_up(n, m):
    return ((n + m - 1) // m) * m


def _make_mlp_kernel(tb, chunk):
    """Kernel for one (tb, 53) batch tile; compute chunked into `chunk` rows."""
    starts = list(range(0, tb, chunk))
    nt_dims = (((1,), (1,)), ((), ()))  # A @ B^T (contract last dims of both)

    def kernel(x_ref, w1_ref, b1_ref, w2_ref, b2_ref, w3t_ref, b3t_ref, o_ref):
        # Weights/biases are small and VMEM-resident; hoist loads out of the loop.
        w1 = w1_ref[...]
        b1 = b1_ref[...]
        w2 = w2_ref[...]
        b2 = b2_ref[...]
        w3t = w3t_ref[...]
        b3t = b3t_ref[...]
        for s in starts:                       # static unrolled chunk loop
            c = min(chunk, tb - s)
            # f32 -> bf16 cast on the VPU (free slot); halves MXU passes.
            xb = x_ref[s:s + c, :].astype(jnp.bfloat16)
            # Layer 1: bf16 MXU matmul, f32 accumulation; bias+ReLU on VPU.
            h1 = jnp.dot(xb, w1, preferred_element_type=jnp.float32)
            h1 = jnp.maximum(h1 + b1, 0.0).astype(jnp.bfloat16)
            # Layer 2
            h2 = jnp.dot(h1, w2, preferred_element_type=jnp.float32)
            h2 = jnp.maximum(h2 + b2, 0.0).astype(jnp.bfloat16)
            # Layer 3 computed transposed (NT dot) so the stored block is
            # lane-dense: (8, c) with the batch chunk on the 128-lane axis.
            o = lax.dot_general(w3t, h2, nt_dims,
                                preferred_element_type=jnp.float32)
            o_ref[:, s:s + c] = (o + b3t).astype(o_ref.dtype)

    return kernel


def ann_forward(x, packed_params, *, out_features=4,
                max_batch_tile=8192, chunk_rows=1024):
    """x: (batch, 53) f32; packed_params from pack_params(). Returns (batch, 4) f32."""
    w1, b1, w2, b2, w3t, b3t = packed_params
    batch, in_features = x.shape
    out_pad = w3t.shape[0]                       # padded output rows (=8)

    # Batch tile: single ragged block for small batches; otherwise a near-even
    # 128-aligned split so awkward batch sizes don't waste a whole extra tile.
    if batch <= max_batch_tile:
        tb = batch
    else:
        nblk = pl.cdiv(batch, max_batch_tile)
        tb = min(max_batch_tile, _round_up(pl.cdiv(batch, nblk), _LANE))
    chunk = min(chunk_rows, tb)
    grid = (pl.cdiv(batch, tb),)

    kernel = _make_mlp_kernel(tb, chunk)
    const = lambda a: pl.BlockSpec(a.shape, lambda i: (0,) * a.ndim)

    params_bytes = sum(int(a.size) * a.dtype.itemsize for a in packed_params)
    cost = pl.CostEstimate(
        flops=int(2 * batch * (in_features * _LANE + _LANE * _LANE + _LANE * out_pad)),
        transcendentals=0,
        bytes_accessed=int(x.size) * x.dtype.itemsize
        + int(out_pad * batch * 4) + params_bytes)

    out_t = pl.pallas_call(
        kernel,
        out_shape=jax.ShapeDtypeStruct((out_pad, batch), jnp.float32),
        grid=grid,
        in_specs=[
            pl.BlockSpec((tb, in_features), lambda i: (i, 0)),  # x: streamed over batch
            const(w1), const(b1), const(w2), const(b2), const(w3t), const(b3t),
        ],
        out_specs=pl.BlockSpec((out_pad, tb), lambda i: (0, i)),  # lane-dense output
        compiler_params=pltpu.CompilerParams(
            dimension_semantics=("parallel",),          # shard batch tiles across TCs
            vmem_limit_bytes=32 * 1024 * 1024),
        cost_estimate=cost,
    )(x, w1, b1, w2, b2, w3t, b3t)

    # Tiny (8, batch) -> (batch, 4) slice + transpose in the wrapper.
    return out_t[:out_features, :].T


def init_params(key, input_features=53, hidden1=20, hidden2=20, out_features=4):
    """Deterministic init mimicking PyTorch's default Linear init
    (uniform +/- 1/sqrt(fan_in)); weights stored as (in, out)."""
    def linear(key, fan_in, fan_out):
        kw, kb = jax.random.split(key)
        bound = 1.0 / jnp.sqrt(jnp.float32(fan_in))
        w = jax.random.uniform(kw, (fan_in, fan_out), jnp.float32, -bound, bound)
        b = jax.random.uniform(kb, (1, fan_out), jnp.float32, -bound, bound)
        return w, b

    k1, k2, k3 = jax.random.split(key, 3)
    w1, b1 = linear(k1, input_features, hidden1)
    w2, b2 = linear(k2, hidden1, hidden2)
    w3, b3 = linear(k3, hidden2, out_features)
    return (w1, b1, w2, b2, w3, b3)


def pack_params(params):
    """One-time padding to lane/sublane-aligned shapes + bf16 cast of weights.
    Zero padding keeps the math exact: padded hidden lanes stay 0 through ReLU
    and contribute nothing downstream; padded output rows are sliced off."""
    w1, b1, w2, b2, w3, b3 = params

    def pad_to(a, shape):
        out = jnp.zeros(shape, a.dtype)
        return out.at[:a.shape[0], :a.shape[1]].set(a)

    w1p = pad_to(w1, (w1.shape[0], _LANE)).astype(jnp.bfloat16)      # (53, 128)
    b1p = pad_to(b1, (1, _LANE))                                     # (1, 128) f32
    w2p = pad_to(w2, (_LANE, _LANE)).astype(jnp.bfloat16)            # (128, 128)
    b2p = pad_to(b2, (1, _LANE))                                     # (1, 128) f32
    w3tp = pad_to(w3, (_LANE, _SUBL)).T.astype(jnp.bfloat16)         # (8, 128)
    b3tp = pad_to(b3, (1, _SUBL)).T                                  # (8, 1) f32
    return (w1p, b1p, w2p, b2p, w3tp, b3tp)


def reference_forward(x, params):
    """Pure-f32 reference matching the PyTorch module."""
    w1, b1, w2, b2, w3, b3 = params
    h1 = jnp.maximum(x @ w1 + b1, 0.0)
    h2 = jnp.maximum(h1 @ w2 + b2, 0.0)
    return h2 @ w3 + b3


if __name__ == "__main__":
    key = jax.random.PRNGKey(0)
    kx, kp = jax.random.split(key)

    input_features, hidden1, hidden2, out_features = 53, 20, 20, 4
    params = init_params(kp, input_features, hidden1, hidden2, out_features)
    packed = pack_params(params)

    # Small smoke test (single block, single chunk).
    batch = 8
    x = jax.random.normal(kx, (batch, input_features), jnp.float32)
    y = jax.block_until_ready(ann_forward(x, packed, out_features=out_features))
    y_ref = reference_forward(x, params)
    assert y.shape == (batch, out_features)
    # bf16 MXU operands (f32 accumulation) vs pure-f32 reference -> loose tolerance.
    assert jnp.allclose(y, y_ref, atol=3e-2, rtol=3e-2), \
        float(jnp.max(jnp.abs(y - y_ref)))

    # Exercise the tiled path (multiple grid blocks, multiple chunks, ragged tail)
    # at still-small shapes.
    batch2 = 300
    x2 = jax.random.normal(kx, (batch2, input_features), jnp.float32)
    y2 = jax.block_until_ready(
        ann_forward(x2, packed, out_features=out_features,
                    max_batch_tile=128, chunk_rows=64))
    y2_ref = reference_forward(x2, params)
    assert y2.shape == (batch2, out_features)
    assert jnp.allclose(y2, y2_ref, atol=3e-2, rtol=3e-2), \
        float(jnp.max(jnp.abs(y2 - y2_ref)))

    print("KERNEL_OK")
</pallas_src>

<mosaic_0001>
module attributes {stable_mosaic.version = 11 : i64} {
  func.func @kernel(%arg0: i32, %arg1: memref<8x53xf32, #tpu.memory_space<vmem>>, %arg2: memref<53x128xbf16, #tpu.memory_space<vmem>>, %arg3: memref<1x128xf32, #tpu.memory_space<vmem>>, %arg4: memref<128x128xbf16, #tpu.memory_space<vmem>>, %arg5: memref<1x128xf32, #tpu.memory_space<vmem>>, %arg6: memref<8x128xbf16, #tpu.memory_space<vmem>>, %arg7: memref<8x1xf32, #tpu.memory_space<vmem>>, %arg8: memref<8x8xf32, #tpu.memory_space<vmem>>) attributes {dimension_semantics = [#tpu.dimension_semantics<parallel>], iteration_bounds = array<i64: 1>, scalar_prefetch = 0 : i64, scratch_operands = 0 : i64, tpu.core_type = #tpu.core_type<tc>, window_params = [{transform_indices = @transform_0, window_bounds = array<i64: 8, 53>}, {pipeline_mode = #tpu.pipeline_mode<synchronous>, transform_indices = @transform_1, window_bounds = array<i64: 53, 128>}, {pipeline_mode = #tpu.pipeline_mode<synchronous>, transform_indices = @transform_2, window_bounds = array<i64: 1, 128>}, {pipeline_mode = #tpu.pipeline_mode<synchronous>, transform_indices = @transform_3, window_bounds = array<i64: 128, 128>}, {pipeline_mode = #tpu.pipeline_mode<synchronous>, transform_indices = @transform_4, window_bounds = array<i64: 1, 128>}, {pipeline_mode = #tpu.pipeline_mode<synchronous>, transform_indices = @transform_5, window_bounds = array<i64: 8, 128>}, {pipeline_mode = #tpu.pipeline_mode<synchronous>, transform_indices = @transform_6, window_bounds = array<i64: 8, 1>}, {transform_indices = @transform_7, window_bounds = array<i64: 8, 8>}]} {
    %c0 = arith.constant 0 : index
    %c0_0 = arith.constant 0 : index
    %0 = vector.load %arg2[%c0, %c0_0] : memref<53x128xbf16, #tpu.memory_space<vmem>>, vector<53x128xbf16>
    %c0_1 = arith.constant 0 : index
    %c0_2 = arith.constant 0 : index
    %1 = vector.load %arg3[%c0_1, %c0_2] : memref<1x128xf32, #tpu.memory_space<vmem>>, vector<1x128xf32>
    %c0_3 = arith.constant 0 : index
    %c0_4 = arith.constant 0 : index
    %2 = vector.load %arg4[%c0_3, %c0_4] : memref<128x128xbf16, #tpu.memory_space<vmem>>, vector<128x128xbf16>
    %c0_5 = arith.constant 0 : index
    %c0_6 = arith.constant 0 : index
    %3 = vector.load %arg5[%c0_5, %c0_6] : memref<1x128xf32, #tpu.memory_space<vmem>>, vector<1x128xf32>
    %c0_7 = arith.constant 0 : index
    %c0_8 = arith.constant 0 : index
    %4 = vector.load %arg6[%c0_7, %c0_8] : memref<8x128xbf16, #tpu.memory_space<vmem>>, vector<8x128xbf16>
    %c0_9 = arith.constant 0 : index
    %c0_10 = arith.constant 0 : index
    %5 = vector.load %arg7[%c0_9, %c0_10] : memref<8x1xf32, #tpu.memory_space<vmem>>, vector<8x1xf32>
    %c0_11 = arith.constant 0 : index
    %c0_12 = arith.constant 0 : index
    %6 = vector.load %arg1[%c0_11, %c0_12] : memref<8x53xf32, #tpu.memory_space<vmem>>, vector<8x53xf32>
    %7 = arith.truncf %6 : vector<8x53xf32> to vector<8x53xbf16>
    %cst = arith.constant dense<0.000000e+00> : vector<8x128xf32>
    %8 = tpu.matmul %7, %0, %cst {dimension_numbers = #tpu.dot_dimension_numbers<[1], [0], [0], [1], [0, 0, 1, 1], [], []>} : vector<8x53xbf16>, vector<53x128xbf16>, vector<8x128xf32> -> vector<8x128xf32>
    %9 = vector.broadcast %1 : vector<1x128xf32> to vector<8x128xf32>
    %10 = arith.addf %8, %9 : vector<8x128xf32>
    %cst_13 = arith.constant 0.000000e+00 : f32
    %11 = vector.broadcast %cst_13 : f32 to vector<8x128xf32>
    %12 = arith.maximumf %10, %11 : vector<8x128xf32>
    %13 = arith.truncf %12 : vector<8x128xf32> to vector<8x128xbf16>
    %cst_14 = arith.constant dense<0.000000e+00> : vector<8x128xf32>
    %14 = tpu.matmul %13, %2, %cst_14 {dimension_numbers = #tpu.dot_dimension_numbers<[1], [0], [0], [1], [0, 0, 1, 1], [], []>} : vector<8x128xbf16>, vector<128x128xbf16>, vector<8x128xf32> -> vector<8x128xf32>
    %15 = vector.broadcast %3 : vector<1x128xf32> to vector<8x128xf32>
    %16 = arith.addf %14, %15 : vector<8x128xf32>
    %cst_15 = arith.constant 0.000000e+00 : f32
    %17 = vector.broadcast %cst_15 : f32 to vector<8x128xf32>
    %18 = arith.maximumf %16, %17 : vector<8x128xf32>
    %19 = arith.truncf %18 : vector<8x128xf32> to vector<8x128xbf16>
    %cst_16 = arith.constant dense<0.000000e+00> : vector<8x8xf32>
    %20 = tpu.matmul %4, %19, %cst_16 {dimension_numbers = #tpu.dot_dimension_numbers<[1], [1], [0], [0], [0, 0, 1, 0], [], []>} : vector<8x128xbf16>, vector<8x128xbf16>, vector<8x8xf32> -> vector<8x8xf32>
    %21 = vector.broadcast %5 : vector<8x1xf32> to vector<8x8xf32>
    %22 = arith.addf %20, %21 : vector<8x8xf32>
    %c0_17 = arith.constant 0 : index
    %c0_18 = arith.constant 0 : index
    %23 = vector.load %arg8[%c0_17, %c0_18] : memref<8x8xf32, #tpu.memory_space<vmem>>, vector<8x8xf32>
    tpu.vector_store %arg8[%c0_17, %c0_18], %22 {strides = array<i32>} : memref<8x8xf32, #tpu.memory_space<vmem>>, vector<8x8xf32>,
    return
  }
  func.func @transform_0(%arg0: i32) -> (i32, i32) {
    %c0_i32 = arith.constant 0 : i32
    %c0_i32_0 = arith.constant 0 : i32
    return %arg0, %c0_i32 : i32, i32
  }
  func.func @transform_1(%arg0: i32) -> (i32, i32) {
    %c0_i32 = arith.constant 0 : i32
    %c0_i32_0 = arith.constant 0 : i32
    %c0_i32_1 = arith.constant 0 : i32
    return %c0_i32, %c0_i32_0 : i32, i32
  }
  func.func @transform_2(%arg0: i32) -> (i32, i32) {
    %c0_i32 = arith.constant 0 : i32
    %c0_i32_0 = arith.constant 0 : i32
    %c0_i32_1 = arith.constant 0 : i32
    return %c0_i32, %c0_i32_0 : i32, i32
  }
  func.func @transform_3(%arg0: i32) -> (i32, i32) {
    %c0_i32 = arith.constant 0 : i32
    %c0_i32_0 = arith.constant 0 : i32
    %c0_i32_1 = arith.constant 0 : i32
    return %c0_i32, %c0_i32_0 : i32, i32
  }
  func.func @transform_4(%arg0: i32) -> (i32, i32) {
    %c0_i32 = arith.constant 0 : i32
    %c0_i32_0 = arith.constant 0 : i32
    %c0_i32_1 = arith.constant 0 : i32
    return %c0_i32, %c0_i32_0 : i32, i32
  }
  func.func @transform_5(%arg0: i32) -> (i32, i32) {
    %c0_i32 = arith.constant 0 : i32
    %c0_i32_0 = arith.constant 0 : i32
    %c0_i32_1 = arith.constant 0 : i32
    return %c0_i32, %c0_i32_0 : i32, i32
  }
  func.func @transform_6(%arg0: i32) -> (i32, i32) {
    %c0_i32 = arith.constant 0 : i32
    %c0_i32_0 = arith.constant 0 : i32
    %c0_i32_1 = arith.constant 0 : i32
    return %c0_i32, %c0_i32_0 : i32, i32
  }
  func.func @transform_7(%arg0: i32) -> (i32, i32) {
    %c0_i32 = arith.constant 0 : i32
    %c0_i32_0 = arith.constant 0 : i32
    return %c0_i32, %arg0 : i32, i32
  }
}

</mosaic_0001>

<bundles_post_ra>
// kernel: tpu_custom_call.1
= control target key start
LH: loop header
LB: loop body
LE: loop exit
PB: predicated region body
PF: predicated region fallthrough
CT: control target
= control target key end

     0   :  { %12 = vsyncpa [#allocation3], 0  ;;  %s590_s0 = inlined_call_operand.vmem [shape: f32[8,53], index: 0, kind: input, shape index: {}]   ;;  %s591_s1 = inlined_call_operand.hbm [shape: bf16[53,128], index: 1, kind: input, shape index: {}]   ;;  %s592_s2 = inlined_call_operand.hbm [shape: f32[1,128], index: 2, kind: input, shape index: {}]   ;;  %s593_s3 = inlined_call_operand.hbm [shape: bf16[128,128], index: 3, kind: input, shape index: {}]   ;;  %s594_s4 = inlined_call_operand.vmem [shape: f32[1,128], index: 4, kind: input, shape index: {}]   ;;  %s595_s5 = inlined_call_operand.vmem [shape: bf16[8,128], index: 5, kind: input, shape index: {}]   ;;  %s596_s6 = inlined_call_operand.vmem [shape: f32[8,1], index: 6, kind: input, shape index: {}]   ;;  %s597_s7 = inlined_call_operand.hbm [shape: f32[8,8], index: 7, kind: output, shape index: {}]  }
   0x1   :  { %13 = vsyncpa [#allocation6], 0 }
   0x2   :  { %14 = vsyncpa [#allocation4], 0  ;;  %s513_s24 = smov [#allocation5]   ;;  %s514_s26 = smov [#allocation2]  }
   0x3   :  { %s35_s25 = sshll.u32 %s513_s24, 4  ;;  %s22_s27 = sshll.u32 %s514_s26, 4  ;;  %s36_s25 = int_to_ptr.vmem [resolvable:$true] %s35_s25  ;;  %s23_s27 = int_to_ptr.vmem [resolvable:$true] %s22_s27 }
   0x4   :  { %s435_s28 = scalar_lea.vmem %s36_s25, 16  ;;  %s439_s29 = scalar_lea.vmem %s36_s25, 32 }
   0x5   :  { %p436_p0 = scmp.ne.s32.totalorder %s36_s25, %s435_s28  ;;  %p440_p1 = scmp.lt.s32.totalorder %s36_s25, %s36_s25 }
   0x6   :  { %p441_p2 = scmp.lt.s32.totalorder %s439_s29, %s435_s28 }
   0x8   :  { %p442_p3 = por %p441_p2, %p440_p1 }
   0xa   :  { %p443_p4 = pnand %p442_p3, %p436_p0 }
   0xc   :  { %446 = shalt.err (!%p443_p4)
}
   0xd   :  { %38 = dma.hbm_to_vmem [thread:$0]  %s592_s2, 16, %s36_s25, [#allocation6]  }
   0xe   :  { %s455_s9 = scalar_lea.vmem %s23_s27, 448  ;;  %p460_p6 = scmp.lt.s32.totalorder %s23_s27, %s23_s27 }
   0xf   :  { %p456_p5 = scmp.ne.s32.totalorder %s23_s27, %s455_s9  ;;  %p461_p7 = scmp.lt.s32.totalorder %s455_s9, %s455_s9 }
  0x11   :  { %p462_p8 = por %p461_p7, %p460_p6 }
  0x13   :  { %p463_p9 = pnand %p462_p8, %p456_p5 }
  0x15   :  { %466 = shalt.err (!%p463_p9)
}
  0x16   :  { %s515_s10 = smov 64   ;;  %s516_s11 = smov 4  }
  0x17   :  { %28 = dma.hbm_to_vmem [thread:$0]  %s591_s1, 448, %s23_s27, [#allocation3], %s515_s10, %s515_s10, %s516_s11  }
  0x18   :  { %s517_s14 = smov [#allocation7]  }
  0x19   :  { %s44_s15 = sshll.u32 %s517_s14, 4  ;;  %s45_s15 = int_to_ptr.vmem [resolvable:$true] %s44_s15 }
  0x1a   :  { %s475_s16 = scalar_lea.vmem %s45_s15, 1024  ;;  %p480_p11 = scmp.lt.s32.totalorder %s45_s15, %s45_s15 }
  0x1b   :  { %p476_p10 = scmp.ne.s32.totalorder %s45_s15, %s475_s16  ;;  %p481_p12 = scmp.lt.s32.totalorder %s475_s16, %s475_s16 }
  0x1d   :  { %p482_p13 = por %p481_p12, %p480_p11 }
  0x1f   :  { %p483_p0 = pnand %p482_p13, %p476_p10 }
  0x21   :  { %486 = shalt.err (!%p483_p0)
}
  0x22   :  { %50 = dma.hbm_to_vmem [thread:$0]  %s593_s3, 1024, %s45_s15, [#allocation6], %s515_s10, %s515_s10, %s516_s11  }
  0x23   :  { %507 = dma.done.wait [#allocation3], 448  }
  0x24   :  { %508 = vsyncadd [#allocation3], 4294966848 }
  0x25   :  { %509 = dma.done.wait [#allocation6], 1040  }
  0x26   :  { %510 = vsyncadd [#allocation6], 4294966256  ;;  %vm127_vm0 = vcmask 1041408   ;;  %v518_v0 = vmov 0.0   ;;  %vm519_vm1 = vmmov 0   ;;  %vm128_vm2 = vcmask 1042432  }
  0x27   :  { %366 = vmatprep.subr.bf16.mxu0 %v518_v0  ;;  %378 = vmatprep.subr.bf16.mxu1 %v518_v0  ;;  %v520_v1 = vmov 65535   ;;  %v415_v4 = vld [vmem:[#allocation2 + $0x18] ss:$0 sps:$4 sm:$0x77]   ;;  %v416_v6 = vld [vmem:[#allocation2 + $0x10] sm:$0xff]   ;;  %v417_v9 = vld [vmem:[#allocation2 + $0x8] sm:$0xff]  }
  0x28   :  { %374 = vmatprep.mubr.msk.bf16.mxu0 %vm519_vm1, %v518_v0  ;;  %394 = vmatprep.mubr.msk.bf16.mxu1 %vm519_vm1, %v518_v0  ;;  %v129_v2 = vsel %vm127_vm0, 4294967295, %v520_v1  ;;  %v419_v7 = vld [vmem:[#allocation7 + $0x38] sm:$0xff]   ;;  %v420_v8 = vld [vmem:[#allocation7 + $0x30] sm:$0xff]   ;;  %v421_v10 = vld [vmem:[#allocation7 + $0x28] sm:$0xff]   ;;  %vm123_vm3 = vcmask 433152   ;;  %v521_v28 = vmov 0  }
  0x29   :  { %v130_v3 = vsel %vm128_vm2, %v129_v2, 0  ;;  %379 = vmatpush3.bf16.msra.mxu1 %v419_v7  ;;  %v418_v11 = vld [vmem:[#allocation2] sm:$0xff]   ;;  %v423_v15 = vld [vmem:[#allocation7 + $0x18] sm:$0xff]   ;;  %v424_v16 = vld [vmem:[#allocation7 + $0x10] sm:$0xff]   ;;  %414 = vset.pattern.permute.xlu0 %v521_v28  ;;  %vm317_vm4 = vcmask 64512  }
  0x2a   :  { %v132_v5 = vand.u32 %v415_v4, %v130_v3  ;;  %380 = vmatprep.subr.bf16.mxu1 %v518_v0  ;;  %v94_v12 = vld [vmem:[%s590_s0] sm:$0xff]  ;;  %v335_v19 = vld [vmem:[#allocation5] ss:$0 sm:$0xff] }
  0x2b   :  { %v422_v13 = vld [vmem:[#allocation7 + $0x20] sm:$0xff]   ;;  %v95_v14 = vpack.c.bf16 %v94_v12, %v94_v12  ;;  %v425_v17 = vld [vmem:[#allocation7 + $0x8] sm:$0xff]  }
  0x2c   :  { %367 = vmatpush3.bf16.msra.mxu0 %v132_v5  ;;  %v426_v18 = vld [vmem:[#allocation7] sm:$0xff]  }
  0x2d   :  { %368 = vmatprep.subr.bf16.mxu0 %v518_v0  ;;  %381 = vmatpush3.bf16.msra.mxu1 %v420_v8  ;;  %v93_v27 = vld [vmem:[%s596_s6] sm:$0xff]  ;;  %s522_s6 = smov [#allocation8]  }
  0x2e   :  { %382 = vmatprep.subr.bf16.mxu1 %v518_v0  ;;  %274 = vperm.xlu0 %414, %v93_v27   ;;  %v341_v29 = vld [vmem:[%s594_s4] ss:$0 sm:$0xff]  ;;  %s325_s23 = sshll.u32 %s522_s6, 4  ;;  %s326_s23 = int_to_ptr.vmem [resolvable:$true] %s325_s23 }
  0x2f   :  { %v92_v37 = vld [vmem:[%s595_s5] sm:$0xf]  ;;  %s487_s4 = scalar_lea.vmem %s326_s23, 128  ;;  %p492_p2 = scmp.lt.s32.totalorder %s326_s23, %s326_s23 }
  0x30   :  { %369 = vmatpush3.bf16.msra.mxu0 %v416_v6  ;;  %p488_p1 = scmp.ne.s32.totalorder %s326_s23, %s487_s4  ;;  %p493_p3 = scmp.lt.s32.totalorder %s487_s4, %s487_s4 }
  0x31   :  { %370 = vmatprep.subr.bf16.mxu0 %v518_v0  ;;  %383 = vmatpush3.bf16.msra.mxu1 %v421_v10 }
  0x32   :  { %384 = vmatprep.subr.bf16.mxu1 %v518_v0  ;;  %p494_p4 = por %p493_p3, %p492_p2 }
  0x34   :  { %371 = vmatpush3.bf16.msra.mxu0 %v417_v9  ;;  %p495_p5 = pnand %p494_p4, %p488_p1 }
  0x35   :  { %372 = vmatprep.subr.bf16.mxu0 %v518_v0  ;;  %385 = vmatpush3.bf16.msra.mxu1 %v422_v13 }
  0x36   :  { %386 = vmatprep.subr.bf16.mxu1 %v518_v0 }
  0x38   :  { %373 = vmatpush3.bf16.msra.mxu0 %v418_v11 }
  0x39   :  { %398 = vmatprep.subr.bf16.mxu0 %v518_v0  ;;  %387 = vmatpush3.bf16.msra.mxu1 %v423_v15 }
  0x3a   :  { %388 = vmatprep.subr.bf16.mxu1 %v518_v0 }
  0x3b   :  { %375 = vmatmul.mubr.msk.bf16.vlgmr.msra.gmra.mxu0 %vm123_vm3, %v95_v14 }
  0x3c   :  { %400 = vmatprep.mubr.msk.bf16.mxu0 %vm519_vm1, %v518_v0 }
  0x3d   :  { %389 = vmatpush3.bf16.msra.mxu1 %v424_v16 }
  0x3e   :  { %390 = vmatprep.subr.bf16.mxu1 %v518_v0 }
  0x41   :  { %391 = vmatpush3.bf16.msra.mxu1 %v425_v17 }
  0x42   :  { %392 = vmatprep.subr.bf16.mxu1 %v518_v0 }
  0x45   :  { %393 = vmatpush3.bf16.msra.mxu1 %v426_v18 }
  0xa9   :  { %v275_v38 = vpop.permute.xlu0 %274 }
  0xfb   :  { %v168_v20 = vpop.f32.mrf.mxu0 }
  0xfc   :  { %v169_v21 = vadd.f32 %v335_v19, %v168_v20 }
  0xfd   :  { %v376_v22 = vpop.f32.mrf.mxu0 }
  0xfe   :  { %v174_v23 = vmax.f32 %v169_v21, 0.0 }
  0xff   :  { %v171_v24 = vpop.f32.mrf.mxu0 }
 0x100   :  { %v175_v25 = vpack.c.bf16 %v174_v23, %v174_v23 }
 0x101   :  { %v377_v26 = vpop.f32.mrf.mxu0 }
 0x102   :  { %395 = vmatmul.mubr.bf16.vlgmr.msra.gmra.mxu1 %v175_v25 }
 0x1c2   :  { %v264_v30 = vpop.f32.mrf.mxu1 }
 0x1c3   :  { %v265_v31 = vadd.f32 %v341_v29, %v264_v30 }
 0x1c4   :  { %v396_v32 = vpop.f32.mrf.mxu1 }
 0x1c5   :  { %v270_v33 = vmax.f32 %v265_v31, 0.0 }
 0x1c6   :  { %v267_v34 = vpop.f32.mrf.mxu1 }
 0x1c7   :  { %v271_v35 = vpack.c.bf16 %v270_v33, %v270_v33 }
 0x1c8   :  { %v397_v36 = vpop.f32.mrf.mxu1 }
 0x1c9   :  { %399 = vmatpush3.bf16.xpose.msra.mxu0 %v271_v35 }
 0x1d0   :  { %401 = vmatmul.mubr.bf16.vlgmr.msra.gmra.mxu0 %v92_v37 }
 0x290   :  { %v311_v39 = vpop.f32.mrf.mxu0 }
 0x291   :  { %v312_v40 = vadd.f32 %v311_v39, %v275_v38 }
 0x292   :  { %v402_v41 = vpop.f32.mrf.mxu0 }
 0x293   :  { %318 = vst.msk [vmem:[#allocation8] sm:$0xff] %vm317_vm4, %v312_v40 }
 0x294   :  { %v314_v42 = vpop.f32.mrf.mxu0 }
 0x295   :  { %498 = shalt.err (!%p495_p5)
}
 0x296   :  { %328 = dma.vmem_to_hbm [thread:$0]  %s326_s23, 128, %s597_s7, [#allocation4]   ;;  %v403_v43 = vpop.f32.mrf.mxu0 }
 0x297   :  { %511 = dma.done.wait [#allocation4], 128  }
 0x298   :  { %512 = vsyncadd [#allocation4], 4294967168 }
 0x299   :  { %332 = vsyncpa [#allocation3], 1 }
 0x29a   :  { %333 = vsyncpa [#allocation6], 1 }
 0x29b   :  { %334 = vsyncpa [#allocation4], 1 }

</bundles_post_ra>
